<compile_context>
chip_gen: v7x
topology: tpu7x:2x2x1
jax: 0.10.0
libtpu: 0.0.40
codegen_flags: <defaults>
</compile_context>

<pallas_src>
import functools

import jax
import jax.numpy as jnp
from jax.experimental import pallas as pl
from jax.experimental.pallas import tpu as pltpu

EPS = 1e-5


# ----------------------------------------------------------------------------
# Kernel
# ----------------------------------------------------------------------------
def _prenorm_conv_kernel(x_ref, wt_ref, cb_ref, o_ref, *, nb, approx_recip):
    """x_ref/o_ref: (nb, C, ts); wt_ref: (C_out, C_in) with LN gain folded in;
    cb_ref: (C_out, 1) f32 with LN bias folded in."""
    wt = wt_ref[...]            # (C, C), f32 or bf16
    cb = cb_ref[...]            # (C, 1), f32

    for n in range(nb):         # static unroll; nb is small (<= 16)
        x = x_ref[n].astype(jnp.float32)                     # (C, ts)
        # One-pass LayerNorm statistics over the channel (sublane) axis.
        mean = jnp.mean(x, axis=0, keepdims=True)             # (1, ts)
        ex2 = jnp.mean(x * x, axis=0, keepdims=True)          # (1, ts)
        var = jnp.maximum(ex2 - mean * mean, 0.0)
        # torch: (x - mean) / (sqrt(biased_var) + eps); EUP recip on fast path.
        inv = pl.reciprocal(jnp.sqrt(var) + EPS, approx=approx_recip)
        y = ((x - mean) * inv).astype(wt.dtype)                # (C, ts)
        # fn = 1x1 conv (LN affine already folded into wt/cb).
        out = jnp.dot(wt, y, preferred_element_type=jnp.float32)
        o_ref[n] = (out + cb).astype(o_ref.dtype)


# ----------------------------------------------------------------------------
# Tiling plan (generation-aware)
# ----------------------------------------------------------------------------
def _round_up(x, m):
    return (x + m - 1) // m * m


def _vmem_capacity_bytes():
    try:
        cap = getattr(pltpu.get_tpu_info(), "vmem_capacity_bytes", None)
        if cap:
            return int(cap)
    except Exception:
        pass
    return 64 << 20  # conservative fallback (v7x per-TC capacity)


def _plan(N, C, HW, in_itemsize, fast, nb=None, ts=None):
    """Pick (nb, ts, vmem_limit): batch images per step, spatial tile, VMEM cap."""
    vmem_cap = _vmem_capacity_bytes()
    # 48 MiB scoped limit on v5e/v6e (128 MiB physical), 28 MiB on v7x (64 MiB/TC).
    vmem_limit = (48 << 20) if vmem_cap >= (100 << 20) else (28 << 20)

    w_itemsize = 2 if fast else 4
    # Resident (constant-index) operands, double-buffered by the pipeline.
    const_bytes = 2 * (C * C * w_itemsize + C * 4)
    budget = max(vmem_limit // 2 - const_bytes, 1 << 20)
    # Streamed bytes per spatial column per image: double-buffered input + output.
    stream_per_lane = 2 * 2 * C * in_itemsize

    if nb is None or ts is None:
        if HW < 512 and N > 1:
            # Late-stage small feature maps: pack batch images per grid step so
            # the per-step lane work stays wide and weight fetches amortize.
            ts0 = HW
            per_img = stream_per_lane * HW
            nb_max = max(1, min(budget // per_img, 2048 // max(HW, 1), N, 16))
            nb0 = 1
            for d in range(int(nb_max), 0, -1):   # prefer a divisor of N
                if N % d == 0:
                    nb0 = d
                    break
        else:
            nb0 = 1
            ts0 = (budget // stream_per_lane) // 128 * 128
            ts0 = max(512, min(ts0, 2048))        # 512 floor: strided-DMA efficiency
            if HW <= ts0:
                ts0 = HW
                # N == 1 and a single spatial tile would leave one v7x TC idle.
                if N == 1 and HW >= 256:
                    ts0 = _round_up(pl.cdiv(HW, 2), 128)
        nb = nb0 if nb is None else nb
        ts = ts0 if ts is None else ts
    return int(nb), int(ts), int(vmem_limit)


# ----------------------------------------------------------------------------
# pallas_call wrapper
# ----------------------------------------------------------------------------
@functools.partial(jax.jit, static_argnames=("nb", "ts", "fast", "vmem_limit"))
def _prenorm_1x1conv_impl(x_nchw, g, b, w, cb, *, nb, ts, fast, vmem_limit):
    N, C, H, W = x_nchw.shape
    HW = H * W
    x3d = x_nchw.reshape(N, C, HW)        # pure reshape of NCHW -- no HBM transpose

    # Fold the LN affine into the 1x1 conv (all in f32 before any bf16 cast):
    #   out = w.T @ ((x-mean)*inv*g + b) + cb
    #       = (w.T * g) @ ((x-mean)*inv) + (w.T @ b + cb)
    wt = jnp.transpose(w).astype(jnp.float32)                     # (C_out, C_in)
    cb_f = (wt @ b.astype(jnp.float32) + cb.astype(jnp.float32)).reshape(C, 1)
    wt_f = wt * g.astype(jnp.float32)[None, :]
    if fast:
        wt_f = wt_f.astype(jnp.bfloat16)  # MXU-native; accumulation stays f32

    grid = (pl.cdiv(N, nb), pl.cdiv(HW, ts))
    kernel = functools.partial(_prenorm_conv_kernel, nb=nb, approx_recip=fast)

    out3d = pl.pallas_call(
        kernel,
        out_shape=jax.ShapeDtypeStruct((N, C, HW), x_nchw.dtype),  # bf16-I/O follows x
        grid_spec=pltpu.PrefetchScalarGridSpec(
            num_scalar_prefetch=0,
            grid=grid,
            in_specs=[
                # streamed activations: (nb, C, ts) tile, spatial on the lane axis
                pl.BlockSpec((nb, C, ts), lambda n, s: (n, 0, s)),
                # folded conv weight / bias: constant block index -> fetched once
                pl.BlockSpec((C, C), lambda n, s: (0, 0)),
                pl.BlockSpec((C, 1), lambda n, s: (0, 0)),
            ],
            out_specs=pl.BlockSpec((nb, C, ts), lambda n, s: (n, 0, s)),
        ),
        compiler_params=pltpu.CompilerParams(
            # both grid axes independent -> megacore sharding on v7x
            dimension_semantics=("parallel", "parallel"),
            vmem_limit_bytes=vmem_limit,
        ),
    )(x3d, wt_f, cb_f)

    return out3d.reshape(N, C, H, W)


def prenorm_1x1conv(x_nchw, g, b, w, cb, *, fast=False, nb=None, ts=None):
    """PreNorm with fn = 1x1 Conv2d:  out = conv1x1(LayerNorm_channel(x)).

    x_nchw: (N, C, H, W), f32 or bf16 (output dtype follows x).
    g, b: LayerNorm gain/bias (C,).  w: conv weight (C_in, C_out).  cb: conv bias (C,).
    fast=True (explicit opt-in) uses bf16 MXU weights/activations and an EUP
    approximate reciprocal for the LN denominator (inference-grade numerics);
    the default keeps full f32 math.
    """
    N, C, H, W = x_nchw.shape
    itemsize = jnp.dtype(x_nchw.dtype).itemsize
    nb, ts, vmem_limit = _plan(N, C, H * W, itemsize, bool(fast), nb=nb, ts=ts)
    return _prenorm_1x1conv_impl(
        x_nchw, g, b, w, cb, nb=nb, ts=ts, fast=bool(fast), vmem_limit=vmem_limit
    )


# ----------------------------------------------------------------------------
# Reference + test harness
# ----------------------------------------------------------------------------
def _reference(x_nchw, g, b, w, cb):
    x = x_nchw.astype(jnp.float32)
    mean = jnp.mean(x, axis=1, keepdims=True)
    var = jnp.mean((x - mean) ** 2, axis=1, keepdims=True)
    std = jnp.sqrt(var)
    y = (x - mean) / (std + EPS) * g.reshape(1, -1, 1, 1) + b.reshape(1, -1, 1, 1)
    out = jnp.einsum("nchw,co->nohw", y, w) + cb.reshape(1, -1, 1, 1)
    return out


def _make_inputs(key, N, C, H, W, x_dtype=jnp.float32):
    kx, kw, kb, kg, kbb = jax.random.split(key, 5)
    x = jax.random.normal(kx, (N, C, H, W), dtype=jnp.float32).astype(x_dtype)
    g = 1.0 + 0.1 * jax.random.normal(kg, (C,), dtype=jnp.float32)
    b = 0.1 * jax.random.normal(kbb, (C,), dtype=jnp.float32)
    w = jax.random.normal(kw, (C, C), dtype=jnp.float32) / jnp.sqrt(C)
    cb = 0.01 * jax.random.normal(kb, (C,), dtype=jnp.float32)
    return x, g, b, w, cb


if __name__ == "__main__":
    key = jax.random.PRNGKey(0)
    k1, k2, k3, k4 = jax.random.split(key, 4)

    # 1) Exact path at the module-like small shape (N=2, C=4, 16x16).
    #    HW=256 < 512 -> batch-packing path (nb=2, single grid step).
    x, g, b, w, cb = _make_inputs(k1, 2, 4, 16, 16)
    out = jax.block_until_ready(prenorm_1x1conv(x, g, b, w, cb))
    ref = _reference(x, g, b, w, cb)
    assert out.shape == x.shape and out.dtype == x.dtype
    assert jnp.allclose(out, ref, atol=1e-4, rtol=1e-4)

    # 2) Fast path (bf16 MXU weights + approx reciprocal) with spatial tiling
    #    and a partial last tile (HW = 400 = 3*128 + 16) -> exercises tail masking.
    x, g, b, w, cb = _make_inputs(k2, 2, 128, 20, 20)
    out = jax.block_until_ready(prenorm_1x1conv(x, g, b, w, cb, fast=True, nb=1, ts=128))
    ref = _reference(x, g, b, w, cb)
    assert jnp.allclose(out, ref, atol=5e-2, rtol=5e-2)

    # 3) Late-Segformer-stage shape (7x7 map): batch packing (nb=4) keeps the
    #    per-step work wide and amortizes step overhead; exact path.
    x, g, b, w, cb = _make_inputs(k3, 4, 32, 7, 7)
    out = jax.block_until_ready(prenorm_1x1conv(x, g, b, w, cb))
    ref = _reference(x, g, b, w, cb)
    assert jnp.allclose(out, ref, atol=1e-4, rtol=1e-4)

    # 4) bf16 I/O (halves HBM traffic) + N==1 spatial split (>=2 grid blocks so
    #    both v7x TensorCores get work); fast path.
    x, g, b, w, cb = _make_inputs(k4, 1, 64, 32, 32, x_dtype=jnp.bfloat16)
    out = jax.block_until_ready(prenorm_1x1conv(x, g, b, w, cb, fast=True))
    ref = _reference(x, g, b, w, cb)
    assert out.dtype == jnp.bfloat16
    assert jnp.allclose(out.astype(jnp.float32), ref, atol=5e-2, rtol=5e-2)

    print("KERNEL_OK")
</pallas_src>

<mosaic_0001>
module attributes {stable_mosaic.version = 11 : i64} {
  func.func @_prenorm_conv_kernel(%arg0: i32, %arg1: i32, %arg2: memref<2x4x256xf32, #tpu.memory_space<vmem>>, %arg3: memref<4x4xf32, #tpu.memory_space<vmem>>, %arg4: memref<4x1xf32, #tpu.memory_space<vmem>>, %arg5: memref<2x4x256xf32, #tpu.memory_space<vmem>>) attributes {dimension_semantics = [#tpu.dimension_semantics<parallel>, #tpu.dimension_semantics<parallel>], iteration_bounds = array<i64: 1, 1>, scalar_prefetch = 0 : i64, scratch_operands = 0 : i64, tpu.core_type = #tpu.core_type<tc>, window_params = [{transform_indices = @transform_0, window_bounds = array<i64: 2, 4, 256>}, {pipeline_mode = #tpu.pipeline_mode<synchronous>, transform_indices = @transform_1, window_bounds = array<i64: 4, 4>}, {pipeline_mode = #tpu.pipeline_mode<synchronous>, transform_indices = @transform_2, window_bounds = array<i64: 4, 1>}, {transform_indices = @transform_3, window_bounds = array<i64: 2, 4, 256>}]} {
    %c0 = arith.constant 0 : index
    %c0_0 = arith.constant 0 : index
    %0 = vector.load %arg3[%c0, %c0_0] : memref<4x4xf32, #tpu.memory_space<vmem>>, vector<4x4xf32>
    %c0_1 = arith.constant 0 : index
    %c0_2 = arith.constant 0 : index
    %1 = vector.load %arg4[%c0_1, %c0_2] : memref<4x1xf32, #tpu.memory_space<vmem>>, vector<4x1xf32>
    %c0_3 = arith.constant 0 : index
    %c0_4 = arith.constant 0 : index
    %c0_5 = arith.constant 0 : index
    %2 = vector.load %arg2[%c0_3, %c0_4, %c0_5] : memref<2x4x256xf32, #tpu.memory_space<vmem>>, vector<1x4x256xf32>
    %3 = vector.shape_cast %2 : vector<1x4x256xf32> to vector<4x256xf32>
    %cst = arith.constant dense<0.000000e+00> : vector<256xf32>
    %4 = vector.multi_reduction <add>, %3, %cst [0] : vector<4x256xf32> to vector<256xf32>
    %5 = vector.shape_cast %4 : vector<256xf32> to vector<1x256xf32>
    %cst_6 = arith.constant 4.000000e+00 : f32
    %6 = vector.broadcast %cst_6 : f32 to vector<1x256xf32>
    %7 = arith.divf %5, %6 : vector<1x256xf32>
    %8 = arith.mulf %3, %3 : vector<4x256xf32>
    %cst_7 = arith.constant dense<0.000000e+00> : vector<256xf32>
    %9 = vector.multi_reduction <add>, %8, %cst_7 [0] : vector<4x256xf32> to vector<256xf32>
    %10 = vector.shape_cast %9 : vector<256xf32> to vector<1x256xf32>
    %cst_8 = arith.constant 4.000000e+00 : f32
    %11 = vector.broadcast %cst_8 : f32 to vector<1x256xf32>
    %12 = arith.divf %10, %11 : vector<1x256xf32>
    %13 = arith.mulf %7, %7 : vector<1x256xf32>
    %14 = arith.subf %12, %13 : vector<1x256xf32>
    %cst_9 = arith.constant 0.000000e+00 : f32
    %15 = vector.broadcast %cst_9 : f32 to vector<1x256xf32>
    %16 = arith.maximumf %14, %15 : vector<1x256xf32>
    %17 = math.sqrt %16 : vector<1x256xf32>
    %cst_10 = arith.constant 9.99999974E-6 : f32
    %18 = vector.broadcast %cst_10 : f32 to vector<1x256xf32>
    %19 = arith.addf %17, %18 : vector<1x256xf32>
    %20 = tpu.reciprocal %19 : vector<1x256xf32> -> vector<1x256xf32>
    %21 = vector.broadcast %7 : vector<1x256xf32> to vector<4x256xf32>
    %22 = arith.subf %3, %21 : vector<4x256xf32>
    %23 = vector.broadcast %20 : vector<1x256xf32> to vector<4x256xf32>
    %24 = arith.mulf %22, %23 : vector<4x256xf32>
    %cst_11 = arith.constant dense<0.000000e+00> : vector<4x256xf32>
    %25 = tpu.matmul %0, %24, %cst_11 {dimension_numbers = #tpu.dot_dimension_numbers<[1], [0], [0], [1], [0, 0, 1, 1], [], []>} : vector<4x4xf32>, vector<4x256xf32>, vector<4x256xf32> -> vector<4x256xf32>
    %26 = vector.broadcast %1 : vector<4x1xf32> to vector<4x256xf32>
    %27 = arith.addf %25, %26 : vector<4x256xf32>
    %c0_12 = arith.constant 0 : index
    %c0_13 = arith.constant 0 : index
    %c0_14 = arith.constant 0 : index
    %28 = vector.load %arg5[%c0_12, %c0_13, %c0_14] : memref<2x4x256xf32, #tpu.memory_space<vmem>>, vector<1x4x256xf32>
    %29 = vector.shape_cast %28 : vector<1x4x256xf32> to vector<4x256xf32>
    %30 = vector.shape_cast %27 : vector<4x256xf32> to vector<1x4x256xf32>
    tpu.vector_store %arg5[%c0_12, %c0_13, %c0_14], %30 {strides = array<i32>} : memref<2x4x256xf32, #tpu.memory_space<vmem>>, vector<1x4x256xf32>,
    %c1 = arith.constant 1 : index
    %c0_15 = arith.constant 0 : index
    %c0_16 = arith.constant 0 : index
    %31 = vector.load %arg2[%c1, %c0_15, %c0_16] : memref<2x4x256xf32, #tpu.memory_space<vmem>>, vector<1x4x256xf32>
    %32 = vector.shape_cast %31 : vector<1x4x256xf32> to vector<4x256xf32>
    %cst_17 = arith.constant dense<0.000000e+00> : vector<256xf32>
    %33 = vector.multi_reduction <add>, %32, %cst_17 [0] : vector<4x256xf32> to vector<256xf32>
    %34 = vector.shape_cast %33 : vector<256xf32> to vector<1x256xf32>
    %cst_18 = arith.constant 4.000000e+00 : f32
    %35 = vector.broadcast %cst_18 : f32 to vector<1x256xf32>
    %36 = arith.divf %34, %35 : vector<1x256xf32>
    %37 = arith.mulf %32, %32 : vector<4x256xf32>
    %cst_19 = arith.constant dense<0.000000e+00> : vector<256xf32>
    %38 = vector.multi_reduction <add>, %37, %cst_19 [0] : vector<4x256xf32> to vector<256xf32>
    %39 = vector.shape_cast %38 : vector<256xf32> to vector<1x256xf32>
    %cst_20 = arith.constant 4.000000e+00 : f32
    %40 = vector.broadcast %cst_20 : f32 to vector<1x256xf32>
    %41 = arith.divf %39, %40 : vector<1x256xf32>
    %42 = arith.mulf %36, %36 : vector<1x256xf32>
    %43 = arith.subf %41, %42 : vector<1x256xf32>
    %cst_21 = arith.constant 0.000000e+00 : f32
    %44 = vector.broadcast %cst_21 : f32 to vector<1x256xf32>
    %45 = arith.maximumf %43, %44 : vector<1x256xf32>
    %46 = math.sqrt %45 : vector<1x256xf32>
    %cst_22 = arith.constant 9.99999974E-6 : f32
    %47 = vector.broadcast %cst_22 : f32 to vector<1x256xf32>
    %48 = arith.addf %46, %47 : vector<1x256xf32>
    %49 = tpu.reciprocal %48 : vector<1x256xf32> -> vector<1x256xf32>
    %50 = vector.broadcast %36 : vector<1x256xf32> to vector<4x256xf32>
    %51 = arith.subf %32, %50 : vector<4x256xf32>
    %52 = vector.broadcast %49 : vector<1x256xf32> to vector<4x256xf32>
    %53 = arith.mulf %51, %52 : vector<4x256xf32>
    %cst_23 = arith.constant dense<0.000000e+00> : vector<4x256xf32>
    %54 = tpu.matmul %0, %53, %cst_23 {dimension_numbers = #tpu.dot_dimension_numbers<[1], [0], [0], [1], [0, 0, 1, 1], [], []>} : vector<4x4xf32>, vector<4x256xf32>, vector<4x256xf32> -> vector<4x256xf32>
    %55 = vector.broadcast %1 : vector<4x1xf32> to vector<4x256xf32>
    %56 = arith.addf %54, %55 : vector<4x256xf32>
    %c1_24 = arith.constant 1 : index
    %c0_25 = arith.constant 0 : index
    %c0_26 = arith.constant 0 : index
    %57 = vector.load %arg5[%c1_24, %c0_25, %c0_26] : memref<2x4x256xf32, #tpu.memory_space<vmem>>, vector<1x4x256xf32>
    %58 = vector.shape_cast %57 : vector<1x4x256xf32> to vector<4x256xf32>
    %59 = vector.shape_cast %56 : vector<4x256xf32> to vector<1x4x256xf32>
    tpu.vector_store %arg5[%c1_24, %c0_25, %c0_26], %59 {strides = array<i32>} : memref<2x4x256xf32, #tpu.memory_space<vmem>>, vector<1x4x256xf32>,
    return
  }
  func.func @transform_0(%arg0: i32, %arg1: i32) -> (i32, i32, i32) {
    %c0_i32 = arith.constant 0 : i32
    %c0_i32_0 = arith.constant 0 : i32
    return %arg0, %c0_i32, %arg1 : i32, i32, i32
  }
  func.func @transform_1(%arg0: i32, %arg1: i32) -> (i32, i32) {
    %c0_i32 = arith.constant 0 : i32
    %c0_i32_0 = arith.constant 0 : i32
    %c0_i32_1 = arith.constant 0 : i32
    return %c0_i32, %c0_i32_0 : i32, i32
  }
  func.func @transform_2(%arg0: i32, %arg1: i32) -> (i32, i32) {
    %c0_i32 = arith.constant 0 : i32
    %c0_i32_0 = arith.constant 0 : i32
    %c0_i32_1 = arith.constant 0 : i32
    return %c0_i32, %c0_i32_0 : i32, i32
  }
  func.func @transform_3(%arg0: i32, %arg1: i32) -> (i32, i32, i32) {
    %c0_i32 = arith.constant 0 : i32
    %c0_i32_0 = arith.constant 0 : i32
    return %arg0, %c0_i32, %arg1 : i32, i32, i32
  }
}

</mosaic_0001>

<bundles_post_ra>
// kernel: _prenorm_1x1conv_impl.1
= control target key start
LH: loop header
LB: loop body
LE: loop exit
PB: predicated region body
PF: predicated region fallthrough
CT: control target
= control target key end

     0   :  { %vm20_vm0 = vcmask 1043456   ;;  %v374_v2 = vmov 0.0   ;;  %v375_v7 = vmov 0   ;;  %vm99_vm9 = vcmask 31744   ;;  %s462_s0 = inlined_call_operand.vmem [shape: f32[2,4,256], index: 0, kind: input, shape index: {}]   ;;  %s463_s2 = inlined_call_operand.vmem [shape: f32[4,1], index: 2, kind: input, shape index: {}]   ;;  %s464_s1 = inlined_call_operand.vmem [shape: f32[4,4], index: 1, kind: input, shape index: {}]   ;;  %s465_s3 = inlined_call_operand.vmem [shape: f32[2,4,256], index: 3, kind: output, shape index: {}]  }
   0x1   :  { %v399_v0 = vld [vmem:[%s462_s0] sm:$0xff]  ;;  %v404_v1 = vld [vmem:[%s462_s0 + $0x8] sm:$0xff]  ;;  %171 = vmatprep.mubr.f32.mxu0 %v374_v2  ;;  %328 = vmatprep.mubr.f32.mxu1 %v374_v2 }
   0x2   :  { %v18_v3 = vcombine.high %v399_v0, %v399_v0  ;;  %v21_v4 = vsel %vm20_vm0, %v399_v0, 0.0  ;;  %v38_v5 = vmul.f32 %v399_v0, %v399_v0  ;;  %v186_v6 = vcombine.high %v404_v1, %v404_v1  ;;  %355 = vset.pattern.permute.xlu0 %v375_v7  ;;  %v15_v8 = vld [vmem:[%s463_s2] sm:$0xf] }
   0x3   :  { %v22_v9 = vrot.slane %v21_v4, 4  ;;  %v188_v10 = vsel %vm20_vm0, %v404_v1, 0.0  ;;  %v204_v11 = vmul.f32 %v404_v1, %v404_v1  ;;  %94 = vperm.xlu0 %355, %v15_v8  }
   0x4   :  { %v28_v12 = vsel %vm20_vm0, %v18_v3, 0.0  ;;  %v40_v13 = vcombine.high %v38_v5, %v38_v5  ;;  %v42_v14 = vsel %vm20_vm0, %v38_v5, 0.0  ;;  %v189_v15 = vrot.slane %v188_v10, 4 }
   0x5   :  { %v23_v16 = vadd.f32 %v22_v9, %v21_v4  ;;  %v29_v17 = vrot.slane %v28_v12, 4  ;;  %v43_v18 = vrot.slane %v42_v14, 4  ;;  %v195_v19 = vsel %vm20_vm0, %v186_v6, 0.0 }
   0x6   :  { %v49_v20 = vsel %vm20_vm0, %v40_v13, 0.0  ;;  %v190_v21 = vadd.f32 %v189_v15, %v188_v10  ;;  %v196_v22 = vrot.slane %v195_v19, 4  ;;  %v206_v23 = vcombine.high %v204_v11, %v204_v11 }
   0x7   :  { %v24_v24 = vrot.slane %v23_v16, 2  ;;  %v30_v25 = vadd.f32 %v29_v17, %v28_v12  ;;  %v44_v26 = vadd.f32 %v43_v18, %v42_v14  ;;  %v50_v27 = vrot.slane %v49_v20, 4 }
   0x8   :  { %v191_v28 = vrot.slane %v190_v21, 2  ;;  %v197_v29 = vadd.f32 %v196_v22, %v195_v19  ;;  %v208_v30 = vsel %vm20_vm0, %v204_v11, 0.0  ;;  %v215_v31 = vsel %vm20_vm0, %v206_v23, 0.0 }
   0x9   :  { %v25_v32 = vadd.f32 %v24_v24, %v23_v16  ;;  %v31_v33 = vrot.slane %v30_v25, 2  ;;  %v45_v34 = vrot.slane %v44_v26, 2  ;;  %v51_v35 = vadd.f32 %v50_v27, %v49_v20 }
   0xa   :  { %v192_v36 = vadd.f32 %v191_v28, %v190_v21  ;;  %v198_v37 = vrot.slane %v197_v29, 2  ;;  %v209_v38 = vrot.slane %v208_v30, 4  ;;  %v216_v39 = vrot.slane %v215_v31, 4 }
   0xb   :  { %v26_v40 = vrot.slane %v25_v32, 1  ;;  %v32_v41 = vadd.f32 %v31_v33, %v30_v25  ;;  %v46_v42 = vadd.f32 %v45_v34, %v44_v26  ;;  %v52_v43 = vrot.slane %v51_v35, 2 }
   0xc   :  { %v193_v44 = vrot.slane %v192_v36, 1  ;;  %v199_v45 = vadd.f32 %v198_v37, %v197_v29  ;;  %v210_v46 = vadd.f32 %v209_v38, %v208_v30  ;;  %v217_v47 = vadd.f32 %v216_v39, %v215_v31 }
   0xd   :  { %v27_v48 = vadd.f32 %v26_v40, %v25_v32  ;;  %v33_v49 = vrot.slane %v32_v41, 1  ;;  %v47_v50 = vrot.slane %v46_v42, 1  ;;  %v53_v51 = vadd.f32 %v52_v43, %v51_v35 }
   0xe   :  { %v194_v52 = vadd.f32 %v193_v44, %v192_v36  ;;  %v200_v53 = vrot.slane %v199_v45, 1  ;;  %v211_v54 = vrot.slane %v210_v46, 2  ;;  %v218_v55 = vrot.slane %v217_v47, 2 }
   0xf   :  { %v34_v56 = vadd.f32 %v33_v49, %v32_v41  ;;  %v427_v57 = vmul.f32 0.25, %v27_v48  ;;  %v48_v58 = vadd.f32 %v47_v50, %v46_v42  ;;  %v54_v59 = vrot.slane %v53_v51, 1 }
  0x10   :  { %v201_v60 = vadd.f32 %v200_v53, %v199_v45  ;;  %v429_v61 = vmul.f32 0.25, %v194_v52  ;;  %v212_v62 = vadd.f32 %v211_v54, %v210_v46  ;;  %v219_v63 = vadd.f32 %v218_v55, %v217_v47 }
  0x11   :  { %v431_v2 = vmul.f32 0.25, %v34_v56  ;;  %v55_v3 = vadd.f32 %v54_v59, %v53_v51  ;;  %v56_v4 = vmul.f32 0.25, %v48_v58  ;;  %v58_v5 = vmul.f32 %v427_v57, %v427_v57 }
  0x12   :  { %v435_v6 = vmul.f32 0.25, %v201_v60  ;;  %v213_v7 = vrot.slane %v212_v62, 1  ;;  %v220_v8 = vrot.slane %v219_v63, 1  ;;  %v224_v14 = vmul.f32 %v429_v61, %v429_v61 }
  0x13   :  { %v57_v9 = vmul.f32 0.25, %v55_v3  ;;  %v59_v10 = vmul.f32 %v431_v2, %v431_v2  ;;  %v60_v11 = vsub.f32 %v56_v4, %v58_v5  ;;  %v84_v49 = vcombine.low %v427_v57, %v431_v2 }
  0x14   :  { %v214_v12 = vadd.f32 %v213_v7, %v212_v62  ;;  %v221_v13 = vadd.f32 %v220_v8, %v219_v63  ;;  %v225_v15 = vmul.f32 %v435_v6, %v435_v6  ;;  %v250_v52 = vcombine.low %v429_v61, %v435_v6  ;;  %v14_v63 = vld [vmem:[%s464_s1] sm:$0xf] }
  0x15   :  { %v61_v16 = vsub.f32 %v57_v9, %v59_v10  ;;  %v62_v17 = vmax.f32 %v60_v11, 0.0  ;;  %v86_v51 = vsub.f32 %v399_v0, %v84_v49 }
  0x16   :  { %v222_v18 = vmul.f32 0.25, %v214_v12  ;;  %v223_v19 = vmul.f32 0.25, %v221_v13  ;;  %v252_v58 = vsub.f32 %v404_v1, %v250_v52 }
  0x17   :  { %v63_v20 = vmax.f32 %v61_v16, 0.0  ;;  %358 = vrsqrt.f32 %v62_v17  ;;  %vm66_vm1 = vcmp.eq.f32.partialorder %v62_v17, inf  ;;  %v69_v26 = vand.u32 2147483648, %v62_v17 }
  0x18   :  { %v226_v21 = vsub.f32 %v222_v18, %v224_v14  ;;  %v227_v22 = vsub.f32 %v223_v19, %v225_v15  ;;  %vm68_vm2 = vcmp.eq.f32.partialorder %v62_v17, 0.0 }
  0x19   :  { %360 = vrsqrt.f32 %v63_v20  ;;  %vm73_vm3 = vcmp.eq.f32.partialorder %v63_v20, inf  ;;  %v76_v29 = vand.u32 2147483648, %v63_v20  ;;  %vm75_vm4 = vcmp.eq.f32.partialorder %v63_v20, 0.0 }
  0x1a   :  { %v228_v23 = vmax.f32 %v226_v21, 0.0  ;;  %v229_v24 = vmax.f32 %v227_v22, 0.0 }
  0x1c   :  { %362 = vrsqrt.f32 %v228_v23  ;;  %vm232_vm5 = vcmp.eq.f32.partialorder %v228_v23, inf  ;;  %vm234_vm6 = vcmp.eq.f32.partialorder %v228_v23, 0.0  ;;  %v235_v36 = vand.u32 2147483648, %v228_v23 }
  0x1d   :  { %364 = vrsqrt.f32 %v229_v24  ;;  %vm239_vm7 = vcmp.eq.f32.partialorder %v229_v24, inf  ;;  %v242_v40 = vand.u32 2147483648, %v229_v24  ;;  %vm241_vm8 = vcmp.eq.f32.partialorder %v229_v24, 0.0 }
  0x21   :  { %v359_v25 = vpop.eup %358 }
  0x22   :  { %v65_v27 = vmul.f32 %v359_v25, %v62_v17 }
  0x23   :  { %v361_v28 = vpop.eup %360 }
  0x24   :  { %v67_v30 = vsel %vm66_vm1, %v62_v17, %v65_v27  ;;  %v72_v31 = vmul.f32 %v361_v28, %v63_v20 }
  0x25   :  { %v70_v32 = vsel %vm68_vm2, %v69_v26, %v67_v30 }
  0x26   :  { %v363_v33 = vpop.eup %362  ;;  %v74_v34 = vsel %vm73_vm3, %v63_v20, %v72_v31  ;;  %v78_v35 = vadd.f32 1e-05, %v70_v32 }
  0x27   :  { %v365_v37 = vpop.eup %364  ;;  %v77_v38 = vsel %vm75_vm4, %v76_v29, %v74_v34  ;;  %v231_v39 = vmul.f32 %v363_v33, %v228_v23 }
  0x28   :  { %v79_v41 = vadd.f32 1e-05, %v77_v38  ;;  %366 = vrcp.f32 %v78_v35  ;;  %v238_v42 = vmul.f32 %v365_v37, %v229_v24 }
  0x29   :  { %v233_v43 = vsel %vm232_vm5, %v228_v23, %v231_v39 }
  0x2a   :  { %368 = vrcp.f32 %v79_v41  ;;  %v236_v44 = vsel %vm234_vm6, %v235_v36, %v233_v43  ;;  %v240_v45 = vsel %vm239_vm7, %v229_v24, %v238_v42 }
  0x2b   :  { %v243_v46 = vsel %vm241_vm8, %v242_v40, %v240_v45  ;;  %v244_v47 = vadd.f32 1e-05, %v236_v44 }
  0x2c   :  { %v245_v48 = vadd.f32 1e-05, %v243_v46 }
  0x2d   :  { %370 = vrcp.f32 %v244_v47 }
  0x2e   :  { %372 = vrcp.f32 %v245_v48 }
  0x32   :  { %v367_v50 = vpop.eup %366 }
  0x34   :  { %v369_v53 = vpop.eup %368 }
  0x35   :  { %v89_v54 = vcombine.low %v367_v50, %v369_v53 }
  0x37   :  { %v371_v55 = vpop.eup %370  ;;  %v91_v56 = vmul.f32 %v89_v54, %v86_v51 }
  0x38   :  { %v373_v59 = vpop.eup %372 }
  0x39   :  { %v98_v60 = vcombine.high %v91_v56, %v91_v56  ;;  %v255_v62 = vcombine.low %v371_v55, %v373_v59 }
  0x3b   :  { %345 = vmatprep.subr.msk.mxu0 %vm20_vm0, %v98_v60  ;;  %v257_v0 = vmul.f32 %v255_v62, %v252_v58 }
  0x3c   :  { %346 = vmatpush1.msk.msra.mxu0 %vm20_vm0, %v91_v56 }
  0x3d   :  { %v259_v57 = vcombine.high %v257_v0, %v257_v0  ;;  %347 = vmatmul.mubr.msk.f32.vlgmr.msra.gmra.mrb[0].mxu0 %vm99_vm9, %v14_v63 }
  0x3f   :  { %349 = vmatprep.subr.msk.mxu1 %vm20_vm0, %v259_v57 }
  0x40   :  { %350 = vmatpush1.msk.msra.mxu1 %vm20_vm0, %v257_v0 }
  0x41   :  { %351 = vmatmul.mubr.msk.f32.vlgmr.msra.gmra.mrb[0].mxu1 %vm99_vm9, %v14_v63 }
  0x82   :  { %v95_v1 = vpop.permute.xlu0 %94 }
 0x110   :  { %v173_v61 = vpop.f32.mrb[0].mxu0 }
 0x111   :  { %v174_v2 = vadd.f32 %v173_v61, %v95_v1  ;;  %v175_v3 = vpop.f32.mrb[1].mxu0 }
 0x112   :  { %v176_v4 = vadd.f32 %v175_v3, %v95_v1 }
 0x114   :  { %v330_v5 = vpop.f32.mrb[0].mxu1  ;;  %v180_v6 = vcombine.low %v174_v2, %v176_v4 }
 0x115   :  { %v331_v7 = vadd.f32 %v330_v5, %v95_v1  ;;  %v332_v8 = vpop.f32.mrb[1].mxu1 }
 0x116   :  { %182 = vst [vmem:[%s465_s3] sm:$0xff] %v180_v6  ;;  %v333_v9 = vadd.f32 %v332_v8, %v95_v1 }
 0x118   :  { %v337_v10 = vcombine.low %v331_v7, %v333_v9 }
 0x11a   :  { %352 = vst [vmem:[%s465_s3 + $0x8] sm:$0xff] %v337_v10 }

</bundles_post_ra>
